<compile_context>
chip_gen: v6e
topology: v6e:2x2x1
jax: 0.10.0
libtpu: 0.0.40
codegen_flags: <defaults>
</compile_context>

<pallas_src>
import functools

import jax
import jax.numpy as jnp
from jax.experimental import pallas as pl
from jax.experimental.pallas import tpu as pltpu


def _round_up(x, m):
    return ((x + m - 1) // m) * m


def _log_softmax(x):
    # numerically-stable log_softmax over the last axis (== F.log_softmax(dim=-1))
    m = jnp.max(x, axis=-1, keepdims=True)
    s = x - m
    lse = jnp.log(jnp.sum(jnp.exp(s), axis=-1, keepdims=True))
    return s - lse


def _fused_kernel(
    code_ref,       # [TB, C]   data code features (batch tile)
    trans_ref,      # [TB, O]   GNN output (batch tile)
    w1_ref,         # [C, H]    MLP layer-1 weight (VMEM resident)
    b1_ref,         # [1, H]
    w2_ref,         # [H, O]    MLP layer-2 weight
    b2_ref,         # [1, O]
    wpc_ref,        # [O, 3F]   packed head weights hit by code_emb:
                    #           [ W_one^T |    0    | W[:, :O]^T ]
    wpt_ref,        # [O, 3F]   packed head weights hit by trans_emb:
                    #           [    0    | W_one^T | W[:, O:]^T ]
    bp_ref,         # [1, 3F]   packed biases [b_one | b_one | b]
    code_out_ref,   # [TB, F]
    trans_out_ref,  # [TB, F]
    final_out_ref,  # [TB, F]
):
    F = code_out_ref.shape[-1]

    # --- code-branch MLP: Linear -> ReLU -> Linear ---
    x = code_ref[...]
    h = jnp.maximum(
        jnp.dot(x, w1_ref[...], preferred_element_type=jnp.float32) + b1_ref[...],
        0.0,
    )
    code_emb = (
        jnp.dot(h, w2_ref[...], preferred_element_type=jnp.float32) + b2_ref[...]
    )

    # --- all three heads as two dots summed (no lane-axis concat / VMEM temp) ---
    logits = (
        jnp.dot(code_emb, wpc_ref[...], preferred_element_type=jnp.float32)
        + jnp.dot(trans_ref[...], wpt_ref[...], preferred_element_type=jnp.float32)
        + bp_ref[...]
    )                                                            # [TB, 3F]

    # --- three per-group log_softmaxes, stored directly (no output concat) ---
    code_out_ref[...] = _log_softmax(logits[:, 0 * F:1 * F])
    trans_out_ref[...] = _log_softmax(logits[:, 1 * F:2 * F])
    final_out_ref[...] = _log_softmax(logits[:, 2 * F:3 * F])


def pack_params(params):
    """One-time weight preprocessing (hoisted out of the per-call path).

    params use the PyTorch convention: weight [out, in], bias [out].
    """
    F, O = params["linear_one_w"].shape                    # [final, output]
    w_one = params["linear_one_w"].T.astype(jnp.float32)   # [O, F]
    wf = params["linear_w"].T.astype(jnp.float32)          # [2O, F]
    zeros = jnp.zeros((O, F), jnp.float32)

    # split packed head weights: logits = code_emb @ wp_code + trans @ wp_trans + b
    wp_code = jnp.concatenate([w_one, zeros, wf[:O]], axis=1)   # [O, 3F]
    wp_trans = jnp.concatenate([zeros, w_one, wf[O:]], axis=1)  # [O, 3F]
    b_pack = jnp.concatenate(
        [params["linear_one_b"], params["linear_one_b"], params["linear_b"]]
    ).reshape(1, 3 * F).astype(jnp.float32)

    return {
        "w1": params["mlp_w1"].T.astype(jnp.float32),            # [C, H]
        "b1": params["mlp_b1"].reshape(1, -1).astype(jnp.float32),
        "w2": params["mlp_w2"].T.astype(jnp.float32),            # [H, O]
        "b2": params["mlp_b2"].reshape(1, -1).astype(jnp.float32),
        "wp_code": wp_code,                                      # [O, 3F]
        "wp_trans": wp_trans,                                    # [O, 3F]
        "b_pack": b_pack,                                        # [1, 3F]
    }


def all_concat_forward(code_x, trans_emb, packed, *, batch_tile=2048):
    """Post-GNN forward of All_Concat_model_MLP_SAGPool_test.

    code_x:    [B, code_input_size]
    trans_emb: [B, output_size]   (SAGPool GNN output, precomputed)
    packed:    output of pack_params()
    Returns (code_prob, trans_prob, final_prob), each [B, final_size].
    """
    B, C = code_x.shape
    O = trans_emb.shape[1]
    H = packed["w1"].shape[1]
    F3 = packed["b_pack"].shape[1]
    F = F3 // 3

    # Batch tiling:
    #  * no input padding -- Pallas masks the ragged last tile (rows are
    #    independent, so garbage pad rows are never stored)
    #  * TB sublane-aligned (multiple of 8) unless it equals the full batch
    #  * aim for >= 2 grid steps when B > 8 so the "parallel" axis can be
    #    sharded across both v7x TensorCores and the auto-pipeline overlaps DMA
    if B <= 8:
        TB = B                                       # full-array block
    else:
        TB = min(batch_tile, _round_up(pl.cdiv(B, 2), 8))
    grid = (pl.cdiv(B, TB),)

    batched = lambda cols: pl.BlockSpec((TB, cols), lambda i: (i, 0))
    resident = lambda shape: pl.BlockSpec(shape, lambda i: (0,) * len(shape))

    code_prob, trans_prob, final_prob = pl.pallas_call(
        _fused_kernel,
        out_shape=(
            jax.ShapeDtypeStruct((B, F), jnp.float32),
            jax.ShapeDtypeStruct((B, F), jnp.float32),
            jax.ShapeDtypeStruct((B, F), jnp.float32),
        ),
        grid=grid,
        in_specs=[
            batched(C),                 # code_x tile
            batched(O),                 # trans_emb tile
            resident((C, H)),           # weights/biases stay VMEM resident
            resident((1, H)),
            resident((H, O)),
            resident((1, O)),
            resident((O, F3)),
            resident((O, F3)),
            resident((1, F3)),
        ],
        out_specs=(batched(F), batched(F), batched(F)),
        compiler_params=pltpu.CompilerParams(
            dimension_semantics=("parallel",),   # shard batch tiles across TCs
        ),
    )(
        code_x, trans_emb,
        packed["w1"], packed["b1"], packed["w2"], packed["b2"],
        packed["wp_code"], packed["wp_trans"], packed["b_pack"],
    )

    return code_prob, trans_prob, final_prob


def init_params(key, code_input_size, code_hidden, output_size, final_size):
    ks = jax.random.split(key, 8)
    s = 0.1
    return {
        "mlp_w1": s * jax.random.normal(ks[0], (code_hidden, code_input_size), jnp.float32),
        "mlp_b1": s * jax.random.normal(ks[1], (code_hidden,), jnp.float32),
        "mlp_w2": s * jax.random.normal(ks[2], (output_size, code_hidden), jnp.float32),
        "mlp_b2": s * jax.random.normal(ks[3], (output_size,), jnp.float32),
        "linear_one_w": s * jax.random.normal(ks[4], (final_size, output_size), jnp.float32),
        "linear_one_b": s * jax.random.normal(ks[5], (final_size,), jnp.float32),
        "linear_w": s * jax.random.normal(ks[6], (final_size, 2 * output_size), jnp.float32),
        "linear_b": s * jax.random.normal(ks[7], (final_size,), jnp.float32),
    }


def reference_forward(code_x, trans_emb, params):
    # pure-JAX reference for correctness sanity check
    def lsm(x):
        return x - jax.scipy.special.logsumexp(x, axis=-1, keepdims=True)

    h = jnp.maximum(code_x @ params["mlp_w1"].T + params["mlp_b1"], 0.0)
    code_emb = h @ params["mlp_w2"].T + params["mlp_b2"]
    code_prob = lsm(code_emb @ params["linear_one_w"].T + params["linear_one_b"])
    trans_prob = lsm(trans_emb @ params["linear_one_w"].T + params["linear_one_b"])
    concat = jnp.concatenate([code_emb, trans_emb], axis=1)
    final_prob = lsm(concat @ params["linear_w"].T + params["linear_b"])
    return code_prob, trans_prob, final_prob


if __name__ == "__main__":
    # small shapes consistent with the module's forward; B chosen so that the
    # grid has 2 steps and the last tile is ragged (exercises masked stores).
    B = 20                 # batch of graphs
    code_input_size = 16   # code feature dim
    code_hidden = 32       # MLP hidden dim
    output_size = 32       # shared embedding dim (MLP / GNN output)
    final_size = 8         # number of classes

    key = jax.random.PRNGKey(0)
    k_code, k_trans, k_params = jax.random.split(key, 3)

    code_x = jax.random.normal(k_code, (B, code_input_size), jnp.float32)
    # TODO(synk): trans_emb stands in for the (untranslated) SAGPool GNN output.
    trans_emb = jax.random.normal(k_trans, (B, output_size), jnp.float32)

    params = init_params(k_params, code_input_size, code_hidden, output_size, final_size)
    packed = pack_params(params)   # one-time packing, hoisted out of the call path

    fwd = jax.jit(functools.partial(all_concat_forward, batch_tile=2048))
    code_prob, trans_prob, final_prob = fwd(code_x, trans_emb, packed)
    jax.block_until_ready((code_prob, trans_prob, final_prob))

    ref_code, ref_trans, ref_final = reference_forward(code_x, trans_emb, params)
    assert jnp.allclose(code_prob, ref_code, atol=1e-4, rtol=1e-4)
    assert jnp.allclose(trans_prob, ref_trans, atol=1e-4, rtol=1e-4)
    assert jnp.allclose(final_prob, ref_final, atol=1e-4, rtol=1e-4)

    print("KERNEL_OK")
</pallas_src>

<mosaic_0001>
module attributes {stable_mosaic.version = 11 : i64} {
  func.func @_fused_kernel(%arg0: i32, %arg1: memref<16x16xf32, #tpu.memory_space<vmem>>, %arg2: memref<16x32xf32, #tpu.memory_space<vmem>>, %arg3: memref<16x32xf32, #tpu.memory_space<vmem>>, %arg4: memref<1x32xf32, #tpu.memory_space<vmem>>, %arg5: memref<32x32xf32, #tpu.memory_space<vmem>>, %arg6: memref<1x32xf32, #tpu.memory_space<vmem>>, %arg7: memref<32x24xf32, #tpu.memory_space<vmem>>, %arg8: memref<32x24xf32, #tpu.memory_space<vmem>>, %arg9: memref<1x24xf32, #tpu.memory_space<vmem>>, %arg10: memref<16x8xf32, #tpu.memory_space<vmem>>, %arg11: memref<16x8xf32, #tpu.memory_space<vmem>>, %arg12: memref<16x8xf32, #tpu.memory_space<vmem>>) attributes {dimension_semantics = [#tpu.dimension_semantics<parallel>], iteration_bounds = array<i64: 2>, scalar_prefetch = 0 : i64, scratch_operands = 0 : i64, tpu.core_type = #tpu.core_type<tc>, window_params = [{transform_indices = @transform_0, window_bounds = array<i64: 16, 16>}, {transform_indices = @transform_1, window_bounds = array<i64: 16, 32>}, {pipeline_mode = #tpu.pipeline_mode<synchronous>, transform_indices = @transform_2, window_bounds = array<i64: 16, 32>}, {pipeline_mode = #tpu.pipeline_mode<synchronous>, transform_indices = @transform_3, window_bounds = array<i64: 1, 32>}, {pipeline_mode = #tpu.pipeline_mode<synchronous>, transform_indices = @transform_4, window_bounds = array<i64: 32, 32>}, {pipeline_mode = #tpu.pipeline_mode<synchronous>, transform_indices = @transform_5, window_bounds = array<i64: 1, 32>}, {pipeline_mode = #tpu.pipeline_mode<synchronous>, transform_indices = @transform_6, window_bounds = array<i64: 32, 24>}, {pipeline_mode = #tpu.pipeline_mode<synchronous>, transform_indices = @transform_7, window_bounds = array<i64: 32, 24>}, {pipeline_mode = #tpu.pipeline_mode<synchronous>, transform_indices = @transform_8, window_bounds = array<i64: 1, 24>}, {transform_indices = @transform_9, window_bounds = array<i64: 16, 8>}, {transform_indices = @transform_10, window_bounds = array<i64: 16, 8>}, {transform_indices = @transform_11, window_bounds = array<i64: 16, 8>}]} {
    %c0 = arith.constant 0 : index
    %c0_0 = arith.constant 0 : index
    %0 = vector.load %arg1[%c0, %c0_0] : memref<16x16xf32, #tpu.memory_space<vmem>>, vector<16x16xf32>
    %c0_1 = arith.constant 0 : index
    %c0_2 = arith.constant 0 : index
    %1 = vector.load %arg3[%c0_1, %c0_2] : memref<16x32xf32, #tpu.memory_space<vmem>>, vector<16x32xf32>
    %cst = arith.constant dense<0.000000e+00> : vector<16x32xf32>
    %2 = tpu.matmul %0, %1, %cst {dimension_numbers = #tpu.dot_dimension_numbers<[1], [0], [0], [1], [0, 0, 1, 1], [], []>} : vector<16x16xf32>, vector<16x32xf32>, vector<16x32xf32> -> vector<16x32xf32>
    %c0_3 = arith.constant 0 : index
    %c0_4 = arith.constant 0 : index
    %3 = vector.load %arg4[%c0_3, %c0_4] : memref<1x32xf32, #tpu.memory_space<vmem>>, vector<1x32xf32>
    %4 = vector.broadcast %3 : vector<1x32xf32> to vector<16x32xf32>
    %5 = arith.addf %2, %4 : vector<16x32xf32>
    %cst_5 = arith.constant 0.000000e+00 : f32
    %6 = vector.broadcast %cst_5 : f32 to vector<16x32xf32>
    %7 = arith.maximumf %5, %6 : vector<16x32xf32>
    %c0_6 = arith.constant 0 : index
    %c0_7 = arith.constant 0 : index
    %8 = vector.load %arg5[%c0_6, %c0_7] : memref<32x32xf32, #tpu.memory_space<vmem>>, vector<32x32xf32>
    %cst_8 = arith.constant dense<0.000000e+00> : vector<16x32xf32>
    %9 = tpu.matmul %7, %8, %cst_8 {dimension_numbers = #tpu.dot_dimension_numbers<[1], [0], [0], [1], [0, 0, 1, 1], [], []>} : vector<16x32xf32>, vector<32x32xf32>, vector<16x32xf32> -> vector<16x32xf32>
    %c0_9 = arith.constant 0 : index
    %c0_10 = arith.constant 0 : index
    %10 = vector.load %arg6[%c0_9, %c0_10] : memref<1x32xf32, #tpu.memory_space<vmem>>, vector<1x32xf32>
    %11 = vector.broadcast %10 : vector<1x32xf32> to vector<16x32xf32>
    %12 = arith.addf %9, %11 : vector<16x32xf32>
    %c0_11 = arith.constant 0 : index
    %c0_12 = arith.constant 0 : index
    %13 = vector.load %arg7[%c0_11, %c0_12] : memref<32x24xf32, #tpu.memory_space<vmem>>, vector<32x24xf32>
    %cst_13 = arith.constant dense<0.000000e+00> : vector<16x24xf32>
    %14 = tpu.matmul %12, %13, %cst_13 {dimension_numbers = #tpu.dot_dimension_numbers<[1], [0], [0], [1], [0, 0, 1, 1], [], []>} : vector<16x32xf32>, vector<32x24xf32>, vector<16x24xf32> -> vector<16x24xf32>
    %c0_14 = arith.constant 0 : index
    %c0_15 = arith.constant 0 : index
    %15 = vector.load %arg2[%c0_14, %c0_15] : memref<16x32xf32, #tpu.memory_space<vmem>>, vector<16x32xf32>
    %c0_16 = arith.constant 0 : index
    %c0_17 = arith.constant 0 : index
    %16 = vector.load %arg8[%c0_16, %c0_17] : memref<32x24xf32, #tpu.memory_space<vmem>>, vector<32x24xf32>
    %cst_18 = arith.constant dense<0.000000e+00> : vector<16x24xf32>
    %17 = tpu.matmul %15, %16, %cst_18 {dimension_numbers = #tpu.dot_dimension_numbers<[1], [0], [0], [1], [0, 0, 1, 1], [], []>} : vector<16x32xf32>, vector<32x24xf32>, vector<16x24xf32> -> vector<16x24xf32>
    %18 = arith.addf %14, %17 : vector<16x24xf32>
    %c0_19 = arith.constant 0 : index
    %c0_20 = arith.constant 0 : index
    %19 = vector.load %arg9[%c0_19, %c0_20] : memref<1x24xf32, #tpu.memory_space<vmem>>, vector<1x24xf32>
    %20 = vector.broadcast %19 : vector<1x24xf32> to vector<16x24xf32>
    %21 = arith.addf %18, %20 : vector<16x24xf32>
    %22 = vector.extract_strided_slice %21 {offsets = [0, 0], sizes = [16, 8], strides = [1, 1]} : vector<16x24xf32> to vector<16x8xf32>
    %cst_21 = arith.constant dense<0xFF800000> : vector<16xf32>
    %23 = vector.multi_reduction <maximumf>, %22, %cst_21 [1] : vector<16x8xf32> to vector<16xf32>
    %24 = vector.shape_cast %23 : vector<16xf32> to vector<16x1xf32>
    %25 = vector.broadcast %24 : vector<16x1xf32> to vector<16x8xf32>
    %26 = arith.subf %22, %25 : vector<16x8xf32>
    %27 = math.exp %26 : vector<16x8xf32>
    %cst_22 = arith.constant dense<0.000000e+00> : vector<16xf32>
    %28 = vector.multi_reduction <add>, %27, %cst_22 [1] : vector<16x8xf32> to vector<16xf32>
    %29 = vector.shape_cast %28 : vector<16xf32> to vector<16x1xf32>
    %30 = math.log %29 : vector<16x1xf32>
    %31 = vector.broadcast %30 : vector<16x1xf32> to vector<16x8xf32>
    %32 = arith.subf %26, %31 : vector<16x8xf32>
    %c0_23 = arith.constant 0 : index
    %c0_24 = arith.constant 0 : index
    %33 = vector.load %arg10[%c0_23, %c0_24] : memref<16x8xf32, #tpu.memory_space<vmem>>, vector<16x8xf32>
    tpu.vector_store %arg10[%c0_23, %c0_24], %32 {strides = array<i32>} : memref<16x8xf32, #tpu.memory_space<vmem>>, vector<16x8xf32>,
    %34 = vector.extract_strided_slice %21 {offsets = [0, 8], sizes = [16, 8], strides = [1, 1]} : vector<16x24xf32> to vector<16x8xf32>
    %cst_25 = arith.constant dense<0xFF800000> : vector<16xf32>
    %35 = vector.multi_reduction <maximumf>, %34, %cst_25 [1] : vector<16x8xf32> to vector<16xf32>
    %36 = vector.shape_cast %35 : vector<16xf32> to vector<16x1xf32>
    %37 = vector.broadcast %36 : vector<16x1xf32> to vector<16x8xf32>
    %38 = arith.subf %34, %37 : vector<16x8xf32>
    %39 = math.exp %38 : vector<16x8xf32>
    %cst_26 = arith.constant dense<0.000000e+00> : vector<16xf32>
    %40 = vector.multi_reduction <add>, %39, %cst_26 [1] : vector<16x8xf32> to vector<16xf32>
    %41 = vector.shape_cast %40 : vector<16xf32> to vector<16x1xf32>
    %42 = math.log %41 : vector<16x1xf32>
    %43 = vector.broadcast %42 : vector<16x1xf32> to vector<16x8xf32>
    %44 = arith.subf %38, %43 : vector<16x8xf32>
    %c0_27 = arith.constant 0 : index
    %c0_28 = arith.constant 0 : index
    %45 = vector.load %arg11[%c0_27, %c0_28] : memref<16x8xf32, #tpu.memory_space<vmem>>, vector<16x8xf32>
    tpu.vector_store %arg11[%c0_27, %c0_28], %44 {strides = array<i32>} : memref<16x8xf32, #tpu.memory_space<vmem>>, vector<16x8xf32>,
    %46 = vector.extract_strided_slice %21 {offsets = [0, 16], sizes = [16, 8], strides = [1, 1]} : vector<16x24xf32> to vector<16x8xf32>
    %cst_29 = arith.constant dense<0xFF800000> : vector<16xf32>
    %47 = vector.multi_reduction <maximumf>, %46, %cst_29 [1] : vector<16x8xf32> to vector<16xf32>
    %48 = vector.shape_cast %47 : vector<16xf32> to vector<16x1xf32>
    %49 = vector.broadcast %48 : vector<16x1xf32> to vector<16x8xf32>
    %50 = arith.subf %46, %49 : vector<16x8xf32>
    %51 = math.exp %50 : vector<16x8xf32>
    %cst_30 = arith.constant dense<0.000000e+00> : vector<16xf32>
    %52 = vector.multi_reduction <add>, %51, %cst_30 [1] : vector<16x8xf32> to vector<16xf32>
    %53 = vector.shape_cast %52 : vector<16xf32> to vector<16x1xf32>
    %54 = math.log %53 : vector<16x1xf32>
    %55 = vector.broadcast %54 : vector<16x1xf32> to vector<16x8xf32>
    %56 = arith.subf %50, %55 : vector<16x8xf32>
    %c0_31 = arith.constant 0 : index
    %c0_32 = arith.constant 0 : index
    %57 = vector.load %arg12[%c0_31, %c0_32] : memref<16x8xf32, #tpu.memory_space<vmem>>, vector<16x8xf32>
    tpu.vector_store %arg12[%c0_31, %c0_32], %56 {strides = array<i32>} : memref<16x8xf32, #tpu.memory_space<vmem>>, vector<16x8xf32>,
    return
  }
  func.func @transform_0(%arg0: i32) -> (i32, i32) {
    %c0_i32 = arith.constant 0 : i32
    %c0_i32_0 = arith.constant 0 : i32
    return %arg0, %c0_i32 : i32, i32
  }
  func.func @transform_1(%arg0: i32) -> (i32, i32) {
    %c0_i32 = arith.constant 0 : i32
    %c0_i32_0 = arith.constant 0 : i32
    return %arg0, %c0_i32 : i32, i32
  }
  func.func @transform_2(%arg0: i32) -> (i32, i32) {
    %c0_i32 = arith.constant 0 : i32
    %c0_i32_0 = arith.constant 0 : i32
    %c0_i32_1 = arith.constant 0 : i32
    return %c0_i32, %c0_i32_0 : i32, i32
  }
  func.func @transform_3(%arg0: i32) -> (i32, i32) {
    %c0_i32 = arith.constant 0 : i32
    %c0_i32_0 = arith.constant 0 : i32
    %c0_i32_1 = arith.constant 0 : i32
    return %c0_i32, %c0_i32_0 : i32, i32
  }
  func.func @transform_4(%arg0: i32) -> (i32, i32) {
    %c0_i32 = arith.constant 0 : i32
    %c0_i32_0 = arith.constant 0 : i32
    %c0_i32_1 = arith.constant 0 : i32
    return %c0_i32, %c0_i32_0 : i32, i32
  }
  func.func @transform_5(%arg0: i32) -> (i32, i32) {
    %c0_i32 = arith.constant 0 : i32
    %c0_i32_0 = arith.constant 0 : i32
    %c0_i32_1 = arith.constant 0 : i32
    return %c0_i32, %c0_i32_0 : i32, i32
  }
  func.func @transform_6(%arg0: i32) -> (i32, i32) {
    %c0_i32 = arith.constant 0 : i32
    %c0_i32_0 = arith.constant 0 : i32
    %c0_i32_1 = arith.constant 0 : i32
    return %c0_i32, %c0_i32_0 : i32, i32
  }
  func.func @transform_7(%arg0: i32) -> (i32, i32) {
    %c0_i32 = arith.constant 0 : i32
    %c0_i32_0 = arith.constant 0 : i32
    %c0_i32_1 = arith.constant 0 : i32
    return %c0_i32, %c0_i32_0 : i32, i32
  }
  func.func @transform_8(%arg0: i32) -> (i32, i32) {
    %c0_i32 = arith.constant 0 : i32
    %c0_i32_0 = arith.constant 0 : i32
    %c0_i32_1 = arith.constant 0 : i32
    return %c0_i32, %c0_i32_0 : i32, i32
  }
  func.func @transform_9(%arg0: i32) -> (i32, i32) {
    %c0_i32 = arith.constant 0 : i32
    %c0_i32_0 = arith.constant 0 : i32
    return %arg0, %c0_i32 : i32, i32
  }
  func.func @transform_10(%arg0: i32) -> (i32, i32) {
    %c0_i32 = arith.constant 0 : i32
    %c0_i32_0 = arith.constant 0 : i32
    return %arg0, %c0_i32 : i32, i32
  }
  func.func @transform_11(%arg0: i32) -> (i32, i32) {
    %c0_i32 = arith.constant 0 : i32
    %c0_i32_0 = arith.constant 0 : i32
    return %arg0, %c0_i32 : i32, i32
  }
}

</mosaic_0001>

<bundles_post_ra>
// kernel: all_concat_forward.1
= control target key start
LH: loop header
LB: loop body
LE: loop exit
PB: predicated region body
PF: predicated region fallthrough
CT: control target
= control target key end

     0   :  { %s2499_s0 = inlined_call_operand.vmem [shape: f32[20,16], index: 0, kind: input, shape index: {}]   ;;  %s2500_s1 = inlined_call_operand.vmem [shape: f32[20,32], index: 1, kind: input, shape index: {}]   ;;  %s2501_s2 = inlined_call_operand.vmem [shape: f32[16,32], index: 2, kind: input, shape index: {}]   ;;  %s2502_s3 = inlined_call_operand.vmem [shape: f32[1,32], index: 3, kind: input, shape index: {}]   ;;  %s2503_s4 = inlined_call_operand.vmem [shape: f32[32,32], index: 4, kind: input, shape index: {}]   ;;  %s2504_s5 = inlined_call_operand.vmem [shape: f32[1,32], index: 5, kind: input, shape index: {}]   ;;  %s2505_s6 = inlined_call_operand.vmem [shape: f32[32,24], index: 6, kind: input, shape index: {}]   ;;  %s2506_s7 = inlined_call_operand.vmem [shape: f32[32,24], index: 7, kind: input, shape index: {}]   ;;  %s2507_s8 = inlined_call_operand.vmem [shape: f32[1,24], index: 8, kind: input, shape index: {}]   ;;  %s2508_s9 = inlined_call_operand.vmem [shape: f32[20,8], index: 9, kind: output, shape index: {0}]   ;;  %s2509_s10 = inlined_call_operand.vmem [shape: f32[20,8], index: 10, kind: output, shape index: {1}]   ;;  %s2510_s11 = inlined_call_operand.vmem [shape: f32[20,8], index: 11, kind: output, shape index: {2}]  }
   0x1   :  { %2511 = sst [smem:[#allocation5_spill]] %s2499_s0 }
   0x2   :  { %2512 = sst [smem:[#allocation6_spill]] %s2500_s1 }
   0x3   :  { %2513 = sst [smem:[#allocation7_spill]] %s2501_s2 }
   0x4   :  { %s2241_s17 = smov 0   ;;  %s2243_s18 = smov 0  }
   0x5   :  { %s2245_s19 = smov 0  }
   0x6 LB: > { %s2254_s20 = sadd.s32 4294967295, %s2081_s19   ;;  %s2256_s21 = sadd.s32 1, %s2081_s19   ;;  %s2081_s19 = sphi %s2245_s19, %s2520_s19   ;;  %s2077_s18 = sphi %s2243_s18, %s2519_s18   ;;  %s2073_s17 = sphi %s2241_s17, %s2518_s17  }
   0x7   : > { %s225_s22 = ssub.s32 %s2081_s19, %s2256_s21  ;;  %s228_s23 = sadd.s32 1, %s2077_s18 }
   0x8   : > { %p226_p0 = scmp.eq.s32.totalorder %s225_s22, 0  ;;  %p238_p1 = scmp.ne.s32.totalorder %s2077_s18, %s2073_s17 }
   0x9   : > { %p239_p2 = scmp.eq.s32.totalorder %s2254_s20, 1  ;;  %p1584_p3 = scmp.ge.s32.totalorder %s2081_s19, 1 }
   0xa   : > { %s2264_s24 = scalar_select %p226_p0, %s2077_s18, %s228_s23  }
   0xb   : > { %p2266_p4 = por %p239_p2, %p238_p1  ;;  %p370_p5 = scmp.lt.s32.totalorder %s2081_s19, 3 }
   0xd   : > { %p371_p6 = pnand %p1584_p3, %p370_p5 }
   0xe   : > { %s2515_s2 = sld [smem:[#allocation7_spill]] (!%p371_p6)  ;;  %s2277_s30 = sshll.u32 (!%p371_p6), %s2254_s20, 1 }
   0xf   : > { %374 = sbr.rel (%p371_p6) target bundleno = 1312 (0x520), region = 56  ;;  %p435_p7 = scmp.lt.s32.totalorder (!%p371_p6), %s2277_s30, 2 }
  0x10   : > { %s2516_s0 = sld [smem:[#allocation5_spill]] (!%p371_p6)  ;;  %s2179_s22 = smov (!%p371_p6), 120  }
  0x11   : > { %s2517_s1 = sld [smem:[#allocation6_spill]] (!%p371_p6)  ;;  %s2180_s23 = smov (!%p371_p6), 112  }
  0x12   : > { %s415_s26 = sand.u32 (!%p371_p6), 1, %s2073_s17  }
  0x13   : > { %s1585_s27 = sshll.u32 (!%p371_p6), %s415_s26, 4 }
  0x14   : > { %v476_v0 = vld [vmem:[%s2515_s2 + $0x8] sm:$0xff]  ;;  %v475_v1 = vld [vmem:[%s2515_s2] sm:$0xff]  ;;  %s2281_s12 = scalar_select %p435_p7, %s2277_s30, 2  ;;  %vm484_vm0 = vcmask 130048   ;;  %v571_v4 = vld [vmem:[%s2503_s4 + $0x18] sm:$0xff]  ;;  %vm579_vm1 = vcmask 261120  }
  0x15   : > { %1681 = vmatprep.subr.mxu0 %v476_v0  ;;  %1688 = vmatprep.subr.mxu1 %v571_v4  ;;  %v570_v5 = vld [vmem:[%s2503_s4 + $0x10] sm:$0xff]  ;;  %v569_v6 = vld [vmem:[%s2503_s4 + $0x8] sm:$0xff]  ;;  %v568_v7 = vld [vmem:[%s2503_s4] sm:$0xff]  ;;  %vm912_vm2 = vcmask 195712   ;;  %vm869_vm3 = vcmask 130112   ;;  %vm842_vm4 = vcmask 64512  }
  0x16   : > { %1682 = vmatpush3.msra.mxu0 %v476_v0  ;;  %s1589_s13 = sshll.u32 %s2281_s12, 3  ;;  %1689 = vmatpush3.msra.mxu1 %v571_v4  ;;  %v670_v8 = vld [vmem:[%s2506_s7 + $0x18] sm:$0xff]  ;;  %v669_v9 = vld [vmem:[%s2506_s7 + $0x10] sm:$0xff]  ;;  %v1592_v11 = vld [vmem:[%s2502_s3] ss:$0 sm:$0xff]  ;;  %s2378_s12 = scalar_lea.vmem [#allocation2], %s1585_s27  }
  0x17   : > { %1683 = vmatprep.subr.mxu0 %v475_v1  ;;  %s438_s16 = scalar_lea.vmem %s2516_s0, %s1589_s13  ;;  %1690 = vmatprep.subr.mxu1 %v570_v5  ;;  %v664_v10 = vld [vmem:[%s2505_s6 + $0x18] sm:$0xff]  ;;  %s452_s15 = scalar_lea.vmem %s2517_s1, %s1589_s13  ;;  %v668_v18 = vld [vmem:[%s2506_s7 + $0x8] sm:$0xff]  ;;  %v663_v19 = vld [vmem:[%s2505_s6 + $0x10] sm:$0xff] }
  0x18   : > { %1684 = vmatpush3.msra.mxu0 %v475_v1  ;;  %v473_v2 = vld [vmem:[%s438_s16] sm:$0xff]  ;;  %v474_v3 = vld [vmem:[%s438_s16 + $0x8] sm:$0xff]  ;;  %1691 = vmatpush3.msra.mxu1 %v570_v5  ;;  %s2384_s28 = scalar_lea.vmem [#allocation3], %s1585_s27   ;;  %s2390_s17 = scalar_lea.vmem [#allocation4], %s1585_s27  }
  0x19   : > { %1685 = vmatprep.mubr.msk.f32.mxu0 %vm484_vm0, %v473_v2  ;;  %1692 = vmatprep.subr.mxu1 %v569_v6  ;;  %v666_v20 = vld [vmem:[%s452_s15 + $0x8] sm:$0xff]  ;;  %v667_v21 = vld [vmem:[%s2506_s7] sm:$0xff]  ;;  %s971_s13 = ssub.s32 (%p2266_p4), 3, %s2277_s30  ;;  %s1650_s29 = sshll.u32 (%p2266_p4), %s2254_s20, 4 }
  0x1a   : > { %1686 = vmatmul.mubr.msk.f32.vlgmr.msra.gmra.mxu0 %vm484_vm0, %v474_v3  ;;  %1693 = vmatpush3.msra.mxu1 %v569_v6  ;;  %v662_v22 = vld [vmem:[%s2505_s6 + $0x8] sm:$0xff]  ;;  %v665_v23 = vld [vmem:[%s452_s15] sm:$0xff]  ;;  %p972_p8 = scmp.lt.s32.totalorder (%p2266_p4), %s971_s13, 2  ;;  %s2403_s15 = scalar_lea.vmem (%p2266_p4), %s2508_s9, %s1650_s29  }
  0x1b   : > { %1694 = vmatprep.subr.mxu1 %v568_v7  ;;  %1699 = vmatprep.subr.mxu0 %v670_v8  ;;  %v661_v24 = vld [vmem:[%s2505_s6] sm:$0xff] }
  0x1c   : > { %1695 = vmatpush3.msra.mxu1 %v568_v7  ;;  %1700 = vmatpush3.msra.mxu0 %v670_v8  ;;  %v1595_v26 = vld [vmem:[%s2504_s5] ss:$0 sm:$0xff] }
  0x1d   : > { %1710 = vmatprep.subr.mxu1 %v664_v10  ;;  %1701 = vmatprep.subr.mxu0 %v669_v9  ;;  %v1602_v36 = vld [vmem:[%s2507_s8] ss:$0 sm:$0xff] }
  0x1e   : > { %1702 = vmatpush3.msra.mxu0 %v669_v9  ;;  %1707 = vmatprep.mubr.msk.f32.mxu0 %vm579_vm1, %v665_v23 }
  0x1f   : > { %1703 = vmatprep.subr.mxu0 %v668_v18 }
  0x20   : > { %1704 = vmatpush3.msra.mxu0 %v668_v18 }
  0x21   : > { %1705 = vmatprep.subr.mxu0 %v667_v21 }
  0x22   : > { %1706 = vmatpush3.msra.mxu0 %v667_v21 }
  0x23   : > { %1708 = vmatmul.mubr.msk.f32.vlgmr.msra.gmra.mxu0 %vm579_vm1, %v666_v20 }
  0xda   : > { %v1687_v12 = vpop.f32.mrf.mxu0 }
  0xdb   : > { %v563_v13 = vadd.f32 %v1687_v12, %v1592_v11 }
  0xdc   : > { %v557_v14 = vpop.f32.mrf.mxu0 }
  0xdd   : > { %v558_v15 = vadd.f32 %v1592_v11, %v557_v14  ;;  %v567_v17 = vmax.f32 %v563_v13, 0.0 }
  0xdf   : > { %v566_v16 = vmax.f32 %v558_v15, 0.0 }
  0xe1   : > { %1696 = vmatprep.mubr.msk.f32.mxu1 %vm579_vm1, %v566_v16 }
  0xe2   : > { %1697 = vmatmul.mubr.msk.f32.vlgmr.msra.gmra.mxu1 %vm579_vm1, %v567_v17 }
  0xe3   : > { %1711 = vmatpush3.msra.mxu1 %v664_v10  ;;  %v1709_v30 = vpop.f32.mrf.mxu0 }
  0xe4   : > { %1712 = vmatprep.subr.mxu1 %v663_v19 }
  0xe5   : > { %1713 = vmatpush3.msra.mxu1 %v663_v19  ;;  %v743_v32 = vpop.f32.mrf.mxu0 }
  0xe6   : > { %1714 = vmatprep.subr.mxu1 %v662_v22 }
  0xe7   : > { %1715 = vmatpush3.msra.mxu1 %v662_v22 }
  0xe8   : > { %1716 = vmatprep.subr.mxu1 %v661_v24 }
  0xe9   : > { %1717 = vmatpush3.msra.mxu1 %v661_v24 }
 0x1a2   : > { %v1698_v25 = vpop.f32.mrf.mxu1 }
 0x1a3   : > { %v658_v29 = vadd.f32 %v1698_v25, %v1595_v26 }
 0x1a4   : > { %v652_v27 = vpop.f32.mrf.mxu1 }
 0x1a5   : > { %v653_v28 = vadd.f32 %v1595_v26, %v652_v27 }
 0x1a7   : > { %1718 = vmatprep.mubr.msk.f32.mxu1 %vm579_vm1, %v653_v28 }
 0x1a8   : > { %1719 = vmatmul.mubr.msk.f32.vlgmr.msra.gmra.mxu1 %vm579_vm1, %v658_v29 }
 0x268   : > { %v1720_v31 = vpop.f32.mrf.mxu1 }
 0x269   : > { %v830_v34 = vadd.f32 %v1720_v31, %v1709_v30 }
 0x26a   : > { %v824_v33 = vpop.f32.mrf.mxu1 }
 0x26b   : > { %v825_v35 = vadd.f32 %v824_v33, %v743_v32  ;;  %v841_v38 = vadd.f32 %v1602_v36, %v830_v34 }
 0x26d   : > { %v840_v37 = vadd.f32 %v1602_v36, %v825_v35  ;;  %v916_v41 = vsel %vm912_vm2, %v841_v38, -inf  ;;  %v873_v42 = vsel %vm869_vm3, %v841_v38, -inf  ;;  %v846_v60 = vsel %vm842_vm4, %v841_v38, -inf }
 0x26f   : > { %v913_v39 = vsel %vm912_vm2, %v840_v37, -inf  ;;  %v870_v40 = vsel %vm869_vm3, %v840_v37, -inf  ;;  %v843_v59 = vsel %vm842_vm4, %v840_v37, -inf }
 0x270   : > { %914 = vmax.xlane.f32.xlu1 %v913_v39  ;;  %871 = vmax.xlane.f32.xlu0 %v870_v40 }
 0x274   : > { %917 = vmax.xlane.f32.xlu1 %v916_v41  ;;  %874 = vmax.xlane.f32.xlu0 %v873_v42 }
 0x2f9   : > { %v872_v43 = vpop.xlane.xlu0 %871  ;;  %v915_v44 = vpop.xlane.xlu1 %914 }
 0x2fa   : > { %v2345_v45 = vsub.f32 %v840_v37, %v872_v43  ;;  %v2350_v49 = vsub.f32 %v840_v37, %v915_v44 }
 0x2fc   : > { %v878_v46 = vmul.f32 1.442695, %v2345_v45  ;;  %v921_v52 = vmul.f32 1.442695, %v2350_v49 }
 0x2fd   : > { %v875_v47 = vpop.xlane.xlu0 %874  ;;  %v918_v50 = vpop.xlane.xlu1 %917 }
 0x2fe   : > { %v2348_v48 = vsub.f32 %v841_v38, %v875_v47  ;;  %1939 = vpow2.f32 %v878_v46  ;;  %v2354_v53 = vsub.f32 %v841_v38, %v918_v50 }
 0x300   : > { %v880_v51 = vmul.f32 1.442695, %v2348_v48  ;;  %v923_v54 = vmul.f32 1.442695, %v2354_v53 }
 0x302   : > { %1941 = vpow2.f32 %v880_v51 }
 0x303   : > { %1943 = vpow2.f32 %v921_v52 }
 0x304   : > { %1945 = vpow2.f32 %v923_v54 }
 0x30b   : > { %v1940_v55 = vpop.eup %1939 }
 0x30c   : > { %884 = vrot.lane.b32.xlu0 %v1940_v55, %s2179_s22 }
 0x30f   : > { %v1942_v56 = vpop.eup %1941 }
 0x310   : > { %886 = vrot.lane.b32.xlu1 %v1942_v56, %s2179_s22  ;;  %v1944_v57 = vpop.eup %1943 }
 0x311   : > { %v1946_v58 = vpop.eup %1945 }
 0x314   : > { %927 = vrot.lane.b32.xlu1 %v1944_v57, %s2180_s23 }
 0x318   : > { %929 = vrot.lane.b32.xlu1 %v1946_v58, %s2180_s23 }
 0x32b   : > { %844 = vmax.xlane.f32.xlu0 %v843_v59 }
 0x33c   : > { %847 = vmax.xlane.f32.xlu1 %v846_v60 }
 0x37e   : > { %v885_v63 = vpop.permute.xlu0 %884 }
 0x37f   : > { %v890_v1 = vsel %vm842_vm4, %v885_v63, 0.0 }
 0x382   : > { %v887_v61 = vpop.permute.xlu1 %886 }
 0x383   : > { %v893_v62 = vsel %vm842_vm4, %v887_v61, 0.0 }
 0x384   : > { %894 = vadd.xlane.f32.xlu0 %v893_v62 }
 0x386   : > { %v928_v0 = vpop.permute.xlu1 %927 }
 0x387   : > { %v933_v4 = vsel %vm842_vm4, %v928_v0, 0.0 }
 0x388   : > { %891 = vadd.xlane.f32.xlu0 %v890_v1 }
 0x38a   : > { %v930_v2 = vpop.permute.xlu1 %929 }
 0x38b   : > { %v936_v3 = vsel %vm842_vm4, %v930_v2, 0.0 }
 0x38c   : > { %937 = vadd.xlane.f32.xlu1 %v936_v3  ;;  %934 = vadd.xlane.f32.xlu0 %v933_v4 }
 0x3b4   : > { %v845_v5 = vpop.xlane.xlu0 %844 }
 0x3b5   : > { %v849_v6 = vsub.f32 %v840_v37, %v845_v5 }
 0x3b7   : > { %v851_v7 = vmul.f32 1.442695, %v849_v6 }
 0x3b9   : > { %1947 = vpow2.f32 %v851_v7 }
 0x3c5   : > { %v848_v8 = vpop.xlane.xlu1 %847 }
 0x3c6   : > { %v1948_v9 = vpop.eup %1947  ;;  %v850_v10 = vsub.f32 %v841_v38, %v848_v8 }
 0x3c7   : > { %v855_v11 = vsel %vm842_vm4, %v1948_v9, 0.0 }
 0x3c8   : > { %v853_v12 = vmul.f32 1.442695, %v850_v10  ;;  %856 = vadd.xlane.f32.xlu0 %v855_v11 }
 0x3ca   : > { %1949 = vpow2.f32 %v853_v12 }
 0x3d7   : > { %v1950_v13 = vpop.eup %1949 }
 0x3d8   : > { %v858_v14 = vsel %vm842_vm4, %v1950_v13, 0.0 }
 0x3d9   : > { %859 = vadd.xlane.f32.xlu1 %v858_v14 }
 0x40d   : > { %v895_v15 = vpop.xlane.xlu0 %894 }
 0x40e   : > { %1951 = vlog2.f32 %v895_v15 }
 0x411   : > { %v892_v16 = vpop.xlane.xlu0 %891 }
 0x412   : > { %1953 = vlog2.f32 %v892_v16 }
 0x415   : > { %v938_v17 = vpop.xlane.xlu1 %937  ;;  %v935_v18 = vpop.xlane.xlu0 %934 }
 0x416   : > { %1955 = vlog2.f32 %v938_v17 }
 0x417   : > { %1957 = vlog2.f32 %v935_v18 }
 0x41b   : > { %v1952_v19 = vpop.eup %1951 }
 0x41c   : > { %v899_v20 = vmul.f32 0.6931472, %v1952_v19 }
 0x41e   : > { %v901_v21 = vsub.f32 %v2348_v48, %v899_v20 }
 0x41f   : > { %v1954_v22 = vpop.eup %1953 }
 0x420   : > { %v897_v23 = vmul.f32 0.6931472, %v1954_v22  ;;  %906 = vrot.lane.b32.xlu1 %v901_v21, %s2179_s22 }
 0x422   : > { %v900_v24 = vsub.f32 %v2345_v45, %v897_v23 }
 0x423   : > { %v1956_v25 = vpop.eup %1955 }
 0x424   : > { %v1958_v26 = vpop.eup %1957  ;;  %904 = vrot.lane.b32.xlu0 %v900_v24, %s2179_s22  ;;  %v942_v28 = vmul.f32 0.6931472, %v1956_v25 }
 0x425   : > { %v940_v27 = vmul.f32 0.6931472, %v1958_v26 }
 0x426   : > { %v944_v30 = vsub.f32 %v2354_v53, %v942_v28 }
 0x427   : > { %v943_v29 = vsub.f32 %v2350_v49, %v940_v27 }
 0x429   : > { %947 = vrot.lane.b32.xlu1 %v943_v29, %s2180_s23 }
 0x42d   : > { %949 = vrot.lane.b32.xlu1 %v944_v30, %s2180_s23 }
 0x451   : > { %v857_v31 = vpop.xlane.xlu0 %856 }
 0x452   : > { %1959 = vlog2.f32 %v857_v31 }
 0x45f   : > { %v1960_v32 = vpop.eup %1959 }
 0x460   : > { %v862_v33 = vmul.f32 0.6931472, %v1960_v32 }
 0x462   : > { %v865_v34 = vsub.f32 %v849_v6, %v862_v33  ;;  %v860_v35 = vpop.xlane.xlu1 %859 }
 0x463   : > { %1961 = vlog2.f32 %v860_v35 }
 0x464   : > { %867 = vst.msk [vmem:[%s2378_s12] sm:$0xff] %vm842_vm4, %v865_v34 }
 0x470   : > { %v1962_v36 = vpop.eup %1961 }
 0x471   : > { %v864_v37 = vmul.f32 0.6931472, %v1962_v36 }
 0x473   : > { %v866_v38 = vsub.f32 %v850_v10, %v864_v37 }
 0x475   : > { %868 = vst.msk [vmem:[%s2378_s12 + $0x8] sm:$0xff] %vm842_vm4, %v866_v38 }
 0x492   : > { %v907_v39 = vpop.permute.xlu1 %906 }
 0x493   : > { %911 = vst.msk [vmem:[%s2384_s28 + $0x8] sm:$0xff] %vm842_vm4, %v907_v39 }
 0x496   : > { %v905_v40 = vpop.permute.xlu0 %904 }
 0x497   : > { %910 = vst.msk [vmem:[%s2384_s28] sm:$0xff] %vm842_vm4, %v905_v40 }
 0x49b   : > { %v948_v41 = vpop.permute.xlu1 %947 }
 0x49c   : > { %953 = vst.msk [vmem:[%s2390_s17] sm:$0xff] %vm842_vm4, %v948_v41  ;;  %969 = sbr.rel (!%p2266_p4) target bundleno = 1224 (0x4c8), region = 60 }
 0x49f   : > { %v950_v42 = vpop.permute.xlu1 %949 }
 0x4a0   : > { %954 = vst.msk [vmem:[%s2390_s17 + $0x8] sm:$0xff] %vm842_vm4, %v950_v42 }
 0x4a1   : > { %s2522_s13 = smov (!%p972_p8, %s971_s13), 2 }
 0x4a2   : > { %s1607_s19 = sshll.u32 %s2522_s13, 7 }
 0x4a3   : > { %p1610_p9 = scmp.eq.s32.totalorder %s1607_s19, 0 }
 0x4a4   : > { %s2409_s22 = sshrl.u32 (!%p1610_p9), %s2522_s13, 1 }
 0x4a5   : > { %980 = sbr.rel (%p1610_p9) target bundleno = 1224 (0x4c8), region = 64  ;;  %p1611_p10 = scmp.le.s32.totalorder (!%p1610_p9), %s2409_s22, 0 }
 0x4aa   : > { %1457 = sbr.rel (%p1611_p10) target bundleno = 1207 (0x4b7), region = 287  ;;  %s2083_s23 = smov (!%p1611_p10), %s2403_s15  }
 0x4ab   : > { %s2087_s26 = smov (!%p1611_p10), %s2378_s12   ;;  %s2091_s27 = smov (!%p1611_p10), 0  }
 0x4ac   : > { %s2095_s14 = smov (!%p1611_p10), 0  }
 0x4af LB: >> { %v1045_v43 = vld [vmem:[%s2089_s26] sm:$0xff]  ;;  %v1047_v44 = vld [vmem:[%s2089_s26 + $0x8] sm:$0xff]  ;;  %s1049_s29 = sadd.s32 1, %s2093_s27  ;;  %s1039_s14 = sadd.s32 1, %s2097_s14   ;;  %s2097_s14 = sphi %s2095_s14, %s1039_s14   ;;  %s2093_s27 = sphi %s2091_s27, %s2092_s27   ;;  %s2089_s26 = sphi %s2087_s26, %s1054_s26   ;;  %s2085_s23 = sphi %s2083_s23, %s1055_s23  }
 0x4b0   : >> { %1046 = vst [vmem:[%s2085_s23] sm:$0xff] %v1045_v43  ;;  %1048 = vst [vmem:[%s2085_s23 + $0x8] sm:$0xff] %v1047_v44  ;;  %p1050_p11 = scmp.ge.s32.totalorder %s1049_s29, %s2409_s22  ;;  %p1038_p12 = scmp.ge.s32.totalorder %s1039_s14, %s2409_s22 }
 0x4b2   : >> { %s2524_s29 = smov (%p1050_p11, %s1049_s29), 0  ;;  %1041 = sbr.rel (!%p1038_p12) target bundleno = 1199 (0x4af), region = 293 }
 0x4b3   : >> { %s1612_s16 = sshll.u32 %s2524_s29, 4  ;;  %s2092_s27 = smov %s2524_s29  }
 0x4b4   : >> { %s1054_s26 = scalar_lea.vmem %s2378_s12, %s1612_s16 [#allocation2]   ;;  %s1055_s23 = scalar_lea.vmem %s2403_s15, %s1612_s16  }
 0x4b7 PF: > { %s2419_s19 = sand.u32 1, %s2522_s13   ;;  %s1651_s27 = sshll.u32 %s2409_s22, 4 }
 0x4b8   : > { %s1060_s0 = scalar_lea.vmem %s2378_s12, %s1651_s27 [#allocation2]   ;;  %s1062_s1 = scalar_lea.vmem %s2403_s15, %s1651_s27  }
 0x4b9   : > { %p1617_p13 = scmp.le.s32.totalorder %s2419_s19, 0 }
 0x4ba   : > { %s2099_s16 = smov (!%p1617_p13), %s1062_s1   ;;  %s2103_s2 = smov (!%p1617_p13), %s1060_s0  }
 0x4bb   : > { %1471 = sbr.rel (%p1617_p13) target bundleno = 1224 (0x4c8), region = 298  ;;  %s2107_s23 = smov (!%p1617_p13), 0  }
 0x4bc   : > { %s2111_s26 = smov (!%p1617_p13), 0  }
 0x4c0 LB: >> { %v1072_v45 = vld [vmem:[%s2105_s2] sm:$0xff]  ;;  %s1074_s13 = sadd.s32 1, %s2109_s23  ;;  %s1066_s26 = sadd.s32 1, %s2113_s26   ;;  %s2113_s26 = sphi %s2111_s26, %s1066_s26   ;;  %s2109_s23 = sphi %s2107_s23, %s2108_s23   ;;  %s2105_s2 = sphi %s2103_s2, %s1079_s2   ;;  %s2101_s16 = sphi %s2099_s16, %s1080_s16  }
 0x4c1   : >> { %1073 = vst [vmem:[%s2101_s16] sm:$0xff] %v1072_v45  ;;  %p1075_p0 = scmp.ge.s32.totalorder %s1074_s13, %s2419_s19  ;;  %p1065_p1 = scmp.ge.s32.totalorder %s1066_s26, %s2419_s19 }
 0x4c3   : >> { %s2526_s13 = smov (%p1075_p0, %s1074_s13), 0  ;;  %1068 = sbr.rel (!%p1065_p1) target bundleno = 1216 (0x4c0), region = 304 }
 0x4c4   : >> { %s1618_s12 = sshll.u32 %s2526_s13, 3  ;;  %s2108_s23 = smov %s2526_s13  }
 0x4c5   : >> { %s1079_s2 = scalar_lea.vmem %s1060_s0, %s1618_s12 [#allocation2]   ;;  %s1080_s16 = scalar_lea.vmem %s1062_s1, %s1618_s12  }
 0x4c8 PF: > { %1086 = sbr.rel (!%p2266_p4) target bundleno = 1268 (0x4f4), region = 112  ;;  %s1088_s15 = ssub.s32 (%p2266_p4), 3, %s2277_s30 }
 0x4c9   : > { %s1653_s22 = sshll.u32 (%p2266_p4), %s2254_s20, 4  ;;  %p1089_p2 = scmp.lt.s32.totalorder (%p2266_p4), %s1088_s15, 2 }
 0x4ca   : > { %s2434_s27 = scalar_lea.vmem (%p2266_p4), %s2509_s10, %s1653_s22  }
 0x4cd   : > { %s2528_s15 = smov (!%p1089_p2, %s1088_s15), 2 }
 0x4ce   : > { %s1621_s2 = sshll.u32 %s2528_s15, 7 }
 0x4cf   : > { %p1624_p3 = scmp.eq.s32.totalorder %s1621_s2, 0 }
 0x4d0   : > { %s2440_s0 = sshrl.u32 (!%p1624_p3), %s2528_s15, 1 }
 0x4d1   : > { %1097 = sbr.rel (%p1624_p3) target bundleno = 1268 (0x4f4), region = 116  ;;  %p1625_p5 = scmp.le.s32.totalorder (!%p1624_p3), %s2440_s0, 0 }
 0x4d6   : > { %1485 = sbr.rel (%p1625_p5) target bundleno = 1251 (0x4e3), region = 309  ;;  %s2115_s1 = smov (!%p1625_p5), %s2434_s27  }
 0x4d7   : > { %s2119_s19 = smov (!%p1625_p5), %s2384_s28   ;;  %s2123_s16 = smov (!%p1625_p5), 0  }
 0x4d8   : > { %s2127_s23 = smov (!%p1625_p5), 0  }
 0x4db LB: >> { %v1162_v46 = vld [vmem:[%s2121_s19] sm:$0xff]  ;;  %v1164_v47 = vld [vmem:[%s2121_s19 + $0x8] sm:$0xff]  ;;  %s1166_s26 = sadd.s32 1, %s2125_s16  ;;  %s1156_s23 = sadd.s32 1, %s2129_s23   ;;  %s2129_s23 = sphi %s2127_s23, %s1156_s23   ;;  %s2125_s16 = sphi %s2123_s16, %s2124_s16   ;;  %s2121_s19 = sphi %s2119_s19, %s1171_s19   ;;  %s2117_s1 = sphi %s2115_s1, %s1172_s1  }
 0x4dc   : >> { %1163 = vst [vmem:[%s2117_s1] sm:$0xff] %v1162_v46  ;;  %1165 = vst [vmem:[%s2117_s1 + $0x8] sm:$0xff] %v1164_v47  ;;  %p1167_p6 = scmp.ge.s32.totalorder %s1166_s26, %s2440_s0  ;;  %p1155_p7 = scmp.ge.s32.totalorder %s1156_s23, %s2440_s0 }
 0x4de   : >> { %s2530_s26 = smov (%p1167_p6, %s1166_s26), 0  ;;  %1158 = sbr.rel (!%p1155_p7) target bundleno = 1243 (0x4db), region = 315 }
 0x4df   : >> { %s1626_s13 = sshll.u32 %s2530_s26, 4  ;;  %s2124_s16 = smov %s2530_s26  }
 0x4e0   : >> { %s1171_s19 = scalar_lea.vmem %s2384_s28, %s1626_s13 [#allocation3]   ;;  %s1172_s1 = scalar_lea.vmem %s2434_s27, %s1626_s13  }
 0x4e3 PF: > { %s2450_s12 = sand.u32 1, %s2528_s15   ;;  %s1654_s22 = sshll.u32 %s2440_s0, 4 }
 0x4e4   : > { %s1177_s14 = scalar_lea.vmem %s2384_s28, %s1654_s22 [#allocation3]   ;;  %s1179_s29 = scalar_lea.vmem %s2434_s27, %s1654_s22  }
 0x4e5   : > { %p1631_p8 = scmp.le.s32.totalorder %s2450_s12, 0 }
 0x4e6   : > { %s2131_s2 = smov (!%p1631_p8), %s1179_s29   ;;  %s2135_s16 = smov (!%p1631_p8), %s1177_s14  }
 0x4e7   : > { %1499 = sbr.rel (%p1631_p8) target bundleno = 1268 (0x4f4), region = 320  ;;  %s2139_s1 = smov (!%p1631_p8), 0  }
 0x4e8   : > { %s2143_s19 = smov (!%p1631_p8), 0  }
 0x4ec LB: >> { %v1189_v48 = vld [vmem:[%s2137_s16] sm:$0xff]  ;;  %s1191_s15 = sadd.s32 1, %s2141_s1  ;;  %s1183_s19 = sadd.s32 1, %s2145_s19   ;;  %s2145_s19 = sphi %s2143_s19, %s1183_s19   ;;  %s2141_s1 = sphi %s2139_s1, %s2140_s1   ;;  %s2137_s16 = sphi %s2135_s16, %s1196_s16   ;;  %s2133_s2 = sphi %s2131_s2, %s1197_s2  }
 0x4ed   : >> { %1190 = vst [vmem:[%s2133_s2] sm:$0xff] %v1189_v48  ;;  %p1192_p9 = scmp.ge.s32.totalorder %s1191_s15, %s2450_s12  ;;  %p1182_p10 = scmp.ge.s32.totalorder %s1183_s19, %s2450_s12 }
 0x4ef   : >> { %s2532_s15 = smov (%p1192_p9, %s1191_s15), 0  ;;  %1185 = sbr.rel (!%p1182_p10) target bundleno = 1260 (0x4ec), region = 326 }
 0x4f0   : >> { %s1632_s28 = sshll.u32 %s2532_s15, 3  ;;  %s2140_s1 = smov %s2532_s15  }
 0x4f1   : >> { %s1196_s16 = scalar_lea.vmem %s1177_s14, %s1632_s28 [#allocation3]   ;;  %s1197_s2 = scalar_lea.vmem %s1179_s29, %s1632_s28  }
 0x4f4 PF: > { %1203 = sbr.rel (!%p2266_p4) target bundleno = 1312 (0x520), region = 164  ;;  %s1205_s27 = ssub.s32 (%p2266_p4), 3, %s2277_s30 }
 0x4f5   : > { %s1656_s0 = sshll.u32 (%p2266_p4), %s2254_s20, 4  ;;  %p1206_p11 = scmp.lt.s32.totalorder (%p2266_p4), %s1205_s27, 2 }
 0x4f6   : > { %s2465_s13 = scalar_lea.vmem (%p2266_p4), %s2510_s11, %s1656_s0  }
 0x4f9   : > { %s2534_s27 = smov (!%p1206_p11, %s1205_s27), 2 }
 0x4fa   : > { %s1635_s22 = sshll.u32 %s2534_s27, 7 }
 0x4fb   : > { %p1638_p12 = scmp.eq.s32.totalorder %s1635_s22, 0 }
 0x4fc   : > { %s2471_s12 = sshrl.u32 (!%p1638_p12), %s2534_s27, 1 }
 0x4fd   : > { %1214 = sbr.rel (%p1638_p12) target bundleno = 1312 (0x520), region = 168  ;;  %p1639_p4 = scmp.le.s32.totalorder (!%p1638_p12), %s2471_s12, 0 }
 0x502   : > { %1513 = sbr.rel (%p1639_p4) target bundleno = 1295 (0x50f), region = 331  ;;  %s2147_s20 = smov (!%p1639_p4), %s2465_s13  }
 0x503   : > { %s2151_s25 = smov (!%p1639_p4), %s2390_s17   ;;  %s2155_s30 = smov (!%p1639_p4), 0  }
 0x504   : > { %s2159_s14 = smov (!%p1639_p4), 0  }
 0x507 LB: >> { %v1279_v49 = vld [vmem:[%s2153_s25] sm:$0xff]  ;;  %v1281_v50 = vld [vmem:[%s2153_s25 + $0x8] sm:$0xff]  ;;  %s1283_s29 = sadd.s32 1, %s2157_s30  ;;  %s1273_s14 = sadd.s32 1, %s2161_s14   ;;  %s2161_s14 = sphi %s2159_s14, %s1273_s14   ;;  %s2157_s30 = sphi %s2155_s30, %s2156_s30   ;;  %s2153_s25 = sphi %s2151_s25, %s1288_s25   ;;  %s2149_s20 = sphi %s2147_s20, %s1289_s20  }
 0x508   : >> { %1280 = vst [vmem:[%s2149_s20] sm:$0xff] %v1279_v49  ;;  %1282 = vst [vmem:[%s2149_s20 + $0x8] sm:$0xff] %v1281_v50  ;;  %p1284_p13 = scmp.ge.s32.totalorder %s1283_s29, %s2471_s12  ;;  %p1272_p0 = scmp.ge.s32.totalorder %s1273_s14, %s2471_s12 }
 0x50a   : >> { %s2536_s29 = smov (%p1284_p13, %s1283_s29), 0  ;;  %1275 = sbr.rel (!%p1272_p0) target bundleno = 1287 (0x507), region = 337 }
 0x50b   : >> { %s1640_s2 = sshll.u32 %s2536_s29, 4  ;;  %s2156_s30 = smov %s2536_s29  }
 0x50c   : >> { %s1288_s25 = scalar_lea.vmem %s2390_s17, %s1640_s2 [#allocation4]   ;;  %s1289_s20 = scalar_lea.vmem %s2465_s13, %s1640_s2  }
 0x50f PF: > { %s2481_s16 = sand.u32 1, %s2534_s27   ;;  %s1657_s1 = sshll.u32 %s2471_s12, 4 }
 0x510   : > { %s1294_s19 = scalar_lea.vmem %s2390_s17, %s1657_s1 [#allocation4]   ;;  %s1296_s15 = scalar_lea.vmem %s2465_s13, %s1657_s1  }
 0x511   : > { %p1645_p1 = scmp.le.s32.totalorder %s2481_s16, 0 }
 0x512   : > { %s2163_s28 = smov (!%p1645_p1), %s1296_s15   ;;  %s2167_s0 = smov (!%p1645_p1), %s1294_s19  }
 0x513   : > { %1527 = sbr.rel (%p1645_p1) target bundleno = 1312 (0x520), region = 342  ;;  %s2171_s23 = smov (!%p1645_p1), 0  }
 0x514   : > { %s2175_s26 = smov (!%p1645_p1), 0  }
 0x518 LB: >> { %v1306_v51 = vld [vmem:[%s2169_s0] sm:$0xff]  ;;  %s1308_s27 = sadd.s32 1, %s2173_s23  ;;  %s1300_s26 = sadd.s32 1, %s2177_s26   ;;  %s2177_s26 = sphi %s2175_s26, %s1300_s26   ;;  %s2173_s23 = sphi %s2171_s23, %s2172_s23   ;;  %s2169_s0 = sphi %s2167_s0, %s1313_s0   ;;  %s2165_s28 = sphi %s2163_s28, %s1314_s28  }
 0x519   : >> { %1307 = vst [vmem:[%s2165_s28] sm:$0xff] %v1306_v51  ;;  %p1309_p2 = scmp.ge.s32.totalorder %s1308_s27, %s2481_s16  ;;  %p1299_p3 = scmp.ge.s32.totalorder %s1300_s26, %s2481_s16 }
 0x51b   : >> { %s2538_s27 = smov (%p1309_p2, %s1308_s27), 0  ;;  %1302 = sbr.rel (!%p1299_p3) target bundleno = 1304 (0x518), region = 348 }
 0x51c   : >> { %s1646_s17 = sshll.u32 %s2538_s27, 3  ;;  %s2172_s23 = smov %s2538_s27  }
 0x51d   : >> { %s1313_s0 = scalar_lea.vmem %s1294_s19, %s1646_s17 [#allocation4]   ;;  %s1314_s28 = scalar_lea.vmem %s1296_s15, %s1646_s17  }
 0x520 PF: > { %p19_p5 = scmp.ge.s32.totalorder %s2256_s21, 4   ;;  %s2518_s17 = smov %s2077_s18 }
 0x521   : > { %s2519_s18 = smov %s2264_s24  ;;  %s2520_s19 = smov %s2256_s21 }
 0x522   :  { %21 = sbr.rel (!%p19_p5) target bundleno = 6 (0x6), region = 359 }

</bundles_post_ra>
